<compile_context>
chip_gen: v7x
topology: tpu7x:2x2x1
jax: 0.10.0
libtpu: 0.0.40
codegen_flags: <defaults>
</compile_context>

<pallas_src>
import functools

import jax
import jax.numpy as jnp
from jax.experimental import pallas as pl
from jax.experimental.pallas import tpu as pltpu


def _round_up(x, m):
    return (x + m - 1) // m * m


def _ls_ce_kernel(preds_ref, target_ref, out_ref, *, n_total, n_classes, block_n):
    """One batch tile: stable lse + fused reductions -> per-tile partial sums."""
    i = pl.program_id(0)

    x = preds_ref[...].astype(jnp.float32)            # (block_n, C), widen here only
    t = target_ref[...]                                # (block_n, 1) int32

    # Numerically stable log-sum-exp along the class (lane) axis.
    m = jnp.max(x, axis=-1, keepdims=True)
    sum_exp = jnp.sum(jnp.exp(x - m), axis=-1, keepdims=True)
    lse = jnp.log(sum_exp) + m                         # (block_n, 1)

    # Fused reductions on the raw logits (never materialize logp = x - lse).
    sum_x = jnp.sum(x, axis=-1, keepdims=True)                         # (block_n, 1)
    col = jax.lax.broadcasted_iota(jnp.int32, x.shape, 1)              # (block_n, C)
    picked_x = jnp.sum(jnp.where(col == t, x, 0.0),
                       axis=-1, keepdims=True)                         # (block_n, 1)

    neg_sum_rows = jnp.float32(n_classes) * lse - sum_x   # -sum_c log_softmax
    nll_rows = lse - picked_x                             # -log_softmax[row, target]

    # Mask padded rows of a ragged final tile.
    rows = i * block_n + jax.lax.broadcasted_iota(jnp.int32, (block_n, 1), 0)
    valid = rows < n_total
    neg_sum_rows = jnp.where(valid, neg_sum_rows, 0.0)
    nll_rows = jnp.where(valid, nll_rows, 0.0)

    s_neg = jnp.sum(neg_sum_rows)
    s_nll = jnp.sum(nll_rows)

    # Per-tile partials in a lane-dense (1, 8, 128) block:
    #   [0, 0, 0] = sum of -sum_c logp, [0, 0, 1] = sum of nll.
    sub = jax.lax.broadcasted_iota(jnp.int32, (1, 8, 128), 1)
    lane = jax.lax.broadcasted_iota(jnp.int32, (1, 8, 128), 2)
    out_ref[...] = jnp.where((sub == 0) & (lane == 0), s_neg,
                             jnp.where((sub == 0) & (lane == 1), s_nll,
                                       jnp.float32(0.0)))


def label_smoothing_cross_entropy(preds, target, epsilon=0.1,
                                  reduction='mean', block_n=None):
    """preds: (N, C) float logits (f32 or bf16); target: (N,) int class ids.

    Returns a scalar f32 for reduction in {'mean', 'sum'}.
    """
    # TODO(synk): reduction='none' (per-sample vector output) not implemented.
    # TODO(synk): nll_loss ignore_index=-100 semantics not implemented.
    assert reduction in ('mean', 'sum')
    n, c = preds.shape
    itemsize = jnp.dtype(preds.dtype).itemsize
    mult = 16 if itemsize < 4 else 8                     # sublane packing

    if block_n is None:
        # Target ~4 MiB per logits tile so double-buffering fits comfortably
        # in scoped VMEM on every generation (incl. v7x's 64 MiB physical).
        target_tile_bytes = 4 * 1024 * 1024
        bn = max(mult, (target_tile_bytes // max(1, c * itemsize)) // mult * mult)
        block_n = min(bn, _round_up(n, mult))
    block_n = max(mult, _round_up(block_n, mult))

    # Pad the batch to a multiple of block_n; padded rows are masked in-kernel.
    n_pad = _round_up(n, block_n)
    if n_pad != n:
        preds = jnp.pad(preds, ((0, n_pad - n), (0, 0)))
        target = jnp.pad(target, ((0, n_pad - n),))
    target2d = target.astype(jnp.int32).reshape(n_pad, 1)
    n_tiles = n_pad // block_n

    # TODO(synk): for very large C (>=32K vocab) add a class-axis grid dim with
    # online (flash-style) running max / sum-exp accumulation.
    kernel = functools.partial(_ls_ce_kernel, n_total=n, n_classes=c,
                               block_n=block_n)

    partials = pl.pallas_call(
        kernel,
        out_shape=jax.ShapeDtypeStruct((n_tiles, 8, 128), jnp.float32),
        grid=(n_tiles,),
        in_specs=[
            pl.BlockSpec((block_n, c), lambda i: (i, 0)),   # logits tile (VMEM)
            pl.BlockSpec((block_n, 1), lambda i: (i, 0)),   # targets tile (VMEM)
        ],
        out_specs=pl.BlockSpec((1, 8, 128), lambda i: (i, 0, 0)),
        compiler_params=pltpu.CompilerParams(
            dimension_semantics=("parallel",),              # megacore-shardable
            vmem_limit_bytes=48 * 1024 * 1024),
    )(preds, target2d)

    # Final (tiny) reduction + epsilon combine in plain JAX.
    neg_sum_total = jnp.sum(partials[:, 0, 0])
    nll_total = jnp.sum(partials[:, 0, 1])
    if reduction == 'mean':
        loss = neg_sum_total / jnp.float32(n)
        nll = nll_total / jnp.float32(n)
    else:  # 'sum'
        loss = neg_sum_total
        nll = nll_total
    return (jnp.float32(epsilon) * (loss / jnp.float32(c))
            + jnp.float32(1.0 - epsilon) * nll)


def _reference(preds, target, epsilon=0.1, reduction='mean'):
    logp = jax.nn.log_softmax(preds.astype(jnp.float32), axis=-1)
    per_row_loss = -jnp.sum(logp, axis=-1)
    per_row_nll = -logp[jnp.arange(preds.shape[0]), target]
    if reduction == 'mean':
        loss, nll = per_row_loss.mean(), per_row_nll.mean()
    else:
        loss, nll = per_row_loss.sum(), per_row_nll.sum()
    c = preds.shape[-1]
    return epsilon * (loss / c) + (1.0 - epsilon) * nll


if __name__ == "__main__":
    key = jax.random.PRNGKey(0)
    k1, k2, k3, k4 = jax.random.split(key, 4)

    # Case 1: f32 logits, multi-tile grid (4 tiles), mean reduction.
    N, C = 64, 128
    preds = jax.random.normal(k1, (N, C), dtype=jnp.float32)
    tgt = jax.random.randint(k2, (N,), 0, C, dtype=jnp.int32)
    out = jax.block_until_ready(
        label_smoothing_cross_entropy(preds, tgt, epsilon=0.1,
                                      reduction='mean', block_n=16))
    ref = _reference(preds, tgt, epsilon=0.1, reduction='mean')
    assert jnp.allclose(out, ref, rtol=1e-5, atol=1e-5), (out, ref)

    # Case 2: bf16 logits, ragged batch (padded + masked), sum reduction.
    N2, C2 = 10, 32
    preds2 = jax.random.normal(k3, (N2, C2), dtype=jnp.bfloat16)
    tgt2 = jax.random.randint(k4, (N2,), 0, C2, dtype=jnp.int32)
    out2 = jax.block_until_ready(
        label_smoothing_cross_entropy(preds2, tgt2, epsilon=0.1,
                                      reduction='sum', block_n=16))
    ref2 = _reference(preds2, tgt2, epsilon=0.1, reduction='sum')
    assert jnp.allclose(out2, ref2, rtol=1e-4, atol=1e-4), (out2, ref2)

    print("KERNEL_OK")
</pallas_src>

<mosaic_0001>
module attributes {stable_mosaic.version = 11 : i64} {
  func.func @_ls_ce_kernel(%arg0: i32, %arg1: memref<16x128xf32, #tpu.memory_space<vmem>>, %arg2: memref<16x1xi32, #tpu.memory_space<vmem>>, %arg3: memref<1x8x128xf32, #tpu.memory_space<vmem>>) attributes {dimension_semantics = [#tpu.dimension_semantics<parallel>], iteration_bounds = array<i64: 4>, scalar_prefetch = 0 : i64, scratch_operands = 0 : i64, tpu.core_type = #tpu.core_type<tc>, window_params = [{transform_indices = @transform_0, window_bounds = array<i64: 16, 128>}, {transform_indices = @transform_1, window_bounds = array<i64: 16, 1>}, {transform_indices = @transform_2, window_bounds = array<i64: 1, 8, 128>}]} {
    %c0 = arith.constant 0 : index
    %c0_0 = arith.constant 0 : index
    %0 = vector.load %arg1[%c0, %c0_0] : memref<16x128xf32, #tpu.memory_space<vmem>>, vector<16x128xf32>
    %c0_1 = arith.constant 0 : index
    %c0_2 = arith.constant 0 : index
    %1 = vector.load %arg2[%c0_1, %c0_2] : memref<16x1xi32, #tpu.memory_space<vmem>>, vector<16x1xi32>
    %cst = arith.constant dense<0xFF800000> : vector<16xf32>
    %2 = vector.multi_reduction <maximumf>, %0, %cst [1] : vector<16x128xf32> to vector<16xf32>
    %3 = vector.shape_cast %2 : vector<16xf32> to vector<16x1xf32>
    %4 = vector.broadcast %3 : vector<16x1xf32> to vector<16x128xf32>
    %5 = arith.subf %0, %4 : vector<16x128xf32>
    %6 = math.exp %5 : vector<16x128xf32>
    %cst_3 = arith.constant dense<0.000000e+00> : vector<16xf32>
    %7 = vector.multi_reduction <add>, %6, %cst_3 [1] : vector<16x128xf32> to vector<16xf32>
    %8 = vector.shape_cast %7 : vector<16xf32> to vector<16x1xf32>
    %9 = math.log %8 : vector<16x1xf32>
    %10 = arith.addf %9, %3 : vector<16x1xf32>
    %cst_4 = arith.constant dense<0.000000e+00> : vector<16xf32>
    %11 = vector.multi_reduction <add>, %0, %cst_4 [1] : vector<16x128xf32> to vector<16xf32>
    %12 = vector.shape_cast %11 : vector<16xf32> to vector<16x1xf32>
    %13 = tpu.iota {dimensions = array<i32: 1>} : vector<16x128xi32>
    %14 = vector.broadcast %1 : vector<16x1xi32> to vector<16x128xi32>
    %15 = arith.cmpi eq, %13, %14 : vector<16x128xi32>
    %cst_5 = arith.constant 0.000000e+00 : f32
    %16 = vector.broadcast %cst_5 : f32 to vector<16x128xf32>
    %17 = arith.select %15, %0, %16 : vector<16x128xi1>, vector<16x128xf32>
    %cst_6 = arith.constant dense<0.000000e+00> : vector<16xf32>
    %18 = vector.multi_reduction <add>, %17, %cst_6 [1] : vector<16x128xf32> to vector<16xf32>
    %19 = vector.shape_cast %18 : vector<16xf32> to vector<16x1xf32>
    %cst_7 = arith.constant 1.280000e+02 : f32
    %20 = vector.broadcast %cst_7 : f32 to vector<16x1xf32>
    %21 = arith.mulf %20, %10 : vector<16x1xf32>
    %22 = arith.subf %21, %12 : vector<16x1xf32>
    %23 = arith.subf %10, %19 : vector<16x1xf32>
    %c16_i32 = arith.constant 16 : i32
    %24 = arith.muli %arg0, %c16_i32 : i32
    %25 = tpu.iota {dimensions = array<i32: 0>} : vector<16x1xi32>
    %26 = vector.broadcast %24 : i32 to vector<16x1xi32>
    %27 = arith.addi %26, %25 : vector<16x1xi32>
    %c64_i32 = arith.constant 64 : i32
    %28 = vector.broadcast %c64_i32 : i32 to vector<16x1xi32>
    %29 = arith.cmpi slt, %27, %28 : vector<16x1xi32>
    %cst_8 = arith.constant 0.000000e+00 : f32
    %30 = vector.broadcast %cst_8 : f32 to vector<16x1xf32>
    %31 = arith.select %29, %22, %30 : vector<16x1xi1>, vector<16x1xf32>
    %cst_9 = arith.constant 0.000000e+00 : f32
    %32 = vector.broadcast %cst_9 : f32 to vector<16x1xf32>
    %33 = arith.select %29, %23, %32 : vector<16x1xi1>, vector<16x1xf32>
    %34 = vector.shape_cast %31 : vector<16x1xf32> to vector<1x16x1xf32>
    %cst_10 = arith.constant dense<0.000000e+00> : vector<1xf32>
    %35 = vector.multi_reduction <add>, %34, %cst_10 [1, 2] : vector<1x16x1xf32> to vector<1xf32>
    %36 = vector.shape_cast %35 : vector<1xf32> to vector<1x1x1xf32>
    %37 = vector.extract %36[0, 0, 0] : f32 from vector<1x1x1xf32>
    %38 = vector.shape_cast %33 : vector<16x1xf32> to vector<1x16x1xf32>
    %cst_11 = arith.constant dense<0.000000e+00> : vector<1xf32>
    %39 = vector.multi_reduction <add>, %38, %cst_11 [1, 2] : vector<1x16x1xf32> to vector<1xf32>
    %40 = vector.shape_cast %39 : vector<1xf32> to vector<1x1x1xf32>
    %41 = vector.extract %40[0, 0, 0] : f32 from vector<1x1x1xf32>
    %42 = tpu.iota {dimensions = array<i32: 1>} : vector<1x8x128xi32>
    %43 = tpu.iota {dimensions = array<i32: 2>} : vector<1x8x128xi32>
    %c0_i32 = arith.constant 0 : i32
    %44 = vector.broadcast %c0_i32 : i32 to vector<1x8x128xi32>
    %45 = arith.cmpi eq, %42, %44 : vector<1x8x128xi32>
    %c0_i32_12 = arith.constant 0 : i32
    %46 = vector.broadcast %c0_i32_12 : i32 to vector<1x8x128xi32>
    %47 = arith.cmpi eq, %43, %46 : vector<1x8x128xi32>
    %48 = arith.andi %45, %47 : vector<1x8x128xi1>
    %c0_i32_13 = arith.constant 0 : i32
    %49 = vector.broadcast %c0_i32_13 : i32 to vector<1x8x128xi32>
    %50 = arith.cmpi eq, %42, %49 : vector<1x8x128xi32>
    %c1_i32 = arith.constant 1 : i32
    %51 = vector.broadcast %c1_i32 : i32 to vector<1x8x128xi32>
    %52 = arith.cmpi eq, %43, %51 : vector<1x8x128xi32>
    %53 = arith.andi %50, %52 : vector<1x8x128xi1>
    %cst_14 = arith.constant 0.000000e+00 : f32
    %54 = vector.broadcast %41 : f32 to vector<1x8x128xf32>
    %55 = vector.broadcast %cst_14 : f32 to vector<1x8x128xf32>
    %56 = arith.select %53, %54, %55 : vector<1x8x128xi1>, vector<1x8x128xf32>
    %57 = vector.broadcast %37 : f32 to vector<1x8x128xf32>
    %58 = arith.select %48, %57, %56 : vector<1x8x128xi1>, vector<1x8x128xf32>
    %c0_15 = arith.constant 0 : index
    %c0_16 = arith.constant 0 : index
    %c0_17 = arith.constant 0 : index
    %59 = vector.load %arg3[%c0_15, %c0_16, %c0_17] : memref<1x8x128xf32, #tpu.memory_space<vmem>>, vector<1x8x128xf32>
    tpu.vector_store %arg3[%c0_15, %c0_16, %c0_17], %58 {strides = array<i32>} : memref<1x8x128xf32, #tpu.memory_space<vmem>>, vector<1x8x128xf32>,
    return
  }
  func.func @transform_0(%arg0: i32) -> (i32, i32) {
    %c0_i32 = arith.constant 0 : i32
    %c0_i32_0 = arith.constant 0 : i32
    return %arg0, %c0_i32 : i32, i32
  }
  func.func @transform_1(%arg0: i32) -> (i32, i32) {
    %c0_i32 = arith.constant 0 : i32
    %c0_i32_0 = arith.constant 0 : i32
    return %arg0, %c0_i32 : i32, i32
  }
  func.func @transform_2(%arg0: i32) -> (i32, i32, i32) {
    %c0_i32 = arith.constant 0 : i32
    %c0_i32_0 = arith.constant 0 : i32
    %c0_i32_1 = arith.constant 0 : i32
    return %arg0, %c0_i32, %c0_i32_0 : i32, i32, i32
  }
}

</mosaic_0001>

<bundles_post_ra>
// kernel: tpu_custom_call.1
= control target key start
LH: loop header
LB: loop body
LE: loop exit
PB: predicated region body
PF: predicated region fallthrough
CT: control target
= control target key end

     0   :  { %7 = vsyncpa [#allocation3], 0  ;;  %s607_s0 = inlined_call_operand.vmem [shape: f32[64,128], index: 0, kind: input, shape index: {}]   ;;  %s608_s1 = inlined_call_operand.vmem [shape: s32[64,1], index: 1, kind: input, shape index: {}]   ;;  %s609_s2 = inlined_call_operand.hbm [shape: f32[4,8,128], index: 2, kind: output, shape index: {}]  }
   0x1   :  { %9 = vsyncpa [#allocation3 + $0x1], 0  ;;  %s498_s9 = smov 0   ;;  %s500_s10 = smov 0  }
   0x2   :  { %s502_s11 = smov 0   ;;  %s504_s12 = smov 0  }
   0x3 LB: > { %s519_s13 = sadd.s32 4294967295, %s479_s12   ;;  %s349_s14 = sadd.s32 4294967294, %s479_s12   ;;  %s479_s12 = sphi %s504_s12, %s615_s12   ;;  %s475_s11 = sphi %s502_s11, %s614_s11   ;;  %s471_s10 = sphi %s500_s10, %s613_s10   ;;  %s467_s9 = sphi %s498_s9, %s612_s9  }
   0x4   : > { %s523_s15 = sadd.s32 1, %s479_s12   ;;  %s74_s16 = sadd.s32 1, %s475_s11 }
   0x5   : > { %s71_s17 = ssub.s32 %s479_s12, %s523_s15  ;;  %p84_p0 = scmp.ne.s32.totalorder %s475_s11, %s471_s10 }
   0x6   : > { %p72_p1 = scmp.eq.s32.totalorder %s71_s17, 0  ;;  %p85_p2 = scmp.eq.s32.totalorder %s519_s13, 3 }
   0x7   : > { %p90_p3 = scmp.ne.s32.totalorder %s471_s10, %s467_s9  ;;  %p91_p4 = scmp.eq.s32.totalorder %s349_s14, 3 }
   0x8   : > { %s534_s18 = scalar_select %p72_p1, %s475_s11, %s74_s16  }
   0x9   : > { %p536_p5 = por %p85_p2, %p84_p0  ;;  %p540_p6 = por %p91_p4, %p90_p3 }
   0xa   : > { %p352_p7 = scmp.ge.s32.totalorder %s479_s12, 1  ;;  %p127_p8 = scmp.lt.s32.totalorder %s479_s12, 5 }
   0xc   : > { %p128_p9 = pnand %p352_p7, %p127_p8 }
   0xd   : > { %s354_s21 = sshll.u32 (!%p128_p9), %s519_s13, 1  ;;  %v481_v0 = vmov (!%p128_p9), 0   ;;  %v194_v11 = vlaneseq (!%p128_p9)  ;;  %s358_s29 = sshll.u32 (!%p128_p9), %s519_s13, 4  ;;  %vm229_vm4 = vcmask (!%p128_p9), 7168  }
   0xe   : > { %131 = sbr.rel (%p128_p9) target bundleno = 576 (0x240), region = 28  ;;  %p155_p10 = scmp.lt.s32.totalorder (!%p128_p9), %s354_s21, 7  ;;  %407 = vset.pattern.permute.xlu1 (!%p128_p9), %v481_v0  ;;  %408 = vset.pattern.permute.xlu0 (!%p128_p9), %v481_v0  ;;  %v220_v29 = vstv (!%p128_p9), %s358_s29 }
   0xf   : > { %v553_v14 = vand.u32 (!%p128_p9), 127, %v194_v11  ;;  %v218_v24 = vshrl.u32 (!%p128_p9), %v194_v11, 7  ;;  %s151_s30 = sand.u32 (!%p128_p9), 1, %s471_s10   ;;  %s360_s4 = sshll.u32 (!%p128_p9), %s519_s13, 7 }
  0x10   : > { %s353_s3 = sshll.u32 (!%p128_p9), %s151_s30, 3  ;;  %s565_s17 = scalar_lea.hbm (!%p128_p9), %s609_s2, %s360_s4 }
  0x11   : > { %v219_v27 = vadd.s32 (!%p128_p9), 8, %v218_v24  ;;  %v221_v33 = vadd.s32 (!%p128_p9), %v220_v29, %v218_v24  ;;  %vm254_vm5 = vcmp.eq.s32.totalorder (!%p128_p9), %v218_v24, 0  ;;  %vm257_vm6 = vcmp.eq.s32.totalorder (!%p128_p9), %v553_v14, 1  ;;  %s153_s6 = scalar_lea.vmem (!%p128_p9), [#allocation2], %s353_s3  ;;  %s265_s13 = scalar_lea.sflag (!%p128_p9), [#allocation3], %s151_s30 }
  0x12   : > { %vm255_vm7 = vcmp.eq.s32.totalorder (!%p128_p9), %v553_v14, 0  ;;  %vm258_vm8 = vmand (!%p128_p9), %vm254_vm5, %vm257_vm6  ;;  %s278_s7 = sshll.u32 (!%p128_p9), %s153_s6, 4  ;;  %s567_s7 = int_to_ptr.vmem [resolvable:$true] %s278_s7 }
  0x13   : > { %v222_v34 = vadd.s32 (!%p128_p9), %v220_v29, %v219_v27  ;;  %vm223_vm2 = vcmp.lt.s32.totalorder (!%p128_p9), %v221_v33, 64  ;;  %vm256_vm9 = vmand (!%p128_p9), %vm254_vm5, %vm255_vm7 }
  0x15   : > { %s617_s21 = smov (!%p155_p10, %s354_s21), 7  ;;  %vm224_vm3 = vcmp.lt.s32.totalorder %v222_v34, 64 }
  0x16   : > { %s355_s22 = sshll.u32 %s617_s21, 3  ;;  %s417_s21 = scalar_lea.vmem %s567_s7, 128 }
  0x17   : > { %s158_s25 = scalar_lea.vmem %s607_s0, %s355_s22  ;;  %s164_s28 = scalar_lea.vmem %s608_s1, %s355_s22 }
  0x18   : > { %v166_v1 = vld [vmem:[%s158_s25] sm:$0xff]  ;;  %v167_v3 = vld [vmem:[%s158_s25 + $0x8] sm:$0xff]  ;;  %p418_p11 = scmp.ne.s32.totalorder %s567_s7, %s417_s21  ;;  %s482_s22 = smov [#allocation2]  }
  0x19   : > { %v168_v2 = vld [vmem:[%s164_s28] sm:$0xff]  ;;  %170 = vmax.xlane.f32.xlu0 %v166_v1  ;;  %v169_v4 = vld [vmem:[%s164_s28 + $0x8] sm:$0xff]  ;;  %s421_s23 = sshll.u32 %s482_s22, 4  ;;  %s422_s23 = int_to_ptr.vmem [resolvable:$false] %s421_s23 }
  0x1a   : > { %197 = vperm.xlu1 %407, %v168_v2   ;;  %p419_p12 = pnand %p418_p11, %p536_p5  ;;  %s423_s24 = scalar_lea.vmem %s422_s23, 256 }
  0x1b   : > { %p424_p0 = scmp.lt.s32.totalorder %s567_s7, %s422_s23  ;;  %p425_p1 = scmp.lt.s32.totalorder %s423_s24, %s417_s21 }
  0x1c   : > { %p420_p13 = pneg %p419_p12 }
  0x1d   : > { %172 = vmax.xlane.f32.xlu0 %v167_v3  ;;  %p426_p2 = por %p425_p1, %p424_p0 }
  0x1e   : > { %200 = vperm.xlu1 %407, %v169_v4  }
  0x1f   : > { %p427_p3 = pnand %p426_p2, %p420_p13 }
  0x99   : > { %v198_v13 = vpop.permute.xlu1 %197 }
  0x9a   : > { %vm202_vm0 = vcmp.eq.s32.totalorder %v553_v14, %v198_v13 }
  0x9b   : > { %v204_v17 = vsel %vm202_vm0, %v166_v1, 0.0 }
  0x9d   : > { %v201_v16 = vpop.permute.xlu1 %200 }
  0x9e   : > { %vm203_vm1 = vcmp.eq.s32.totalorder %v553_v14, %v201_v16 }
  0x9f   : > { %v205_v18 = vsel %vm203_vm1, %v167_v3, 0.0 }
  0xa6   : > { %v171_v5 = vpop.xlane.xlu0 %170 }
  0xa7   : > { %v174_v6 = vsub.f32 %v166_v1, %v171_v5 }
  0xa9   : > { %v176_v7 = vmul.f32 1.442695, %v174_v6 }
  0xaa   : > { %v173_v8 = vpop.xlane.xlu0 %172 }
  0xab   : > { %409 = vpow2.f32 %v176_v7  ;;  %v175_v9 = vsub.f32 %v167_v3, %v173_v8 }
  0xad   : > { %v178_v10 = vmul.f32 1.442695, %v175_v9 }
  0xaf   : > { %411 = vpow2.f32 %v178_v10 }
  0xb5   : > { %v410_v12 = vpop.eup %409 }
  0xb6   : > { %180 = vadd.xlane.f32.xlu0 %v410_v12 }
  0xb9   : > { %v412_v15 = vpop.eup %411 }
  0xba   : > { %182 = vadd.xlane.f32.xlu1 %v412_v15  ;;  %190 = vadd.xlane.f32.xlu0 %v166_v1 }
  0xbe   : > { %192 = vadd.xlane.f32.xlu0 %v167_v3 }
  0xc2   : > { %206 = vadd.xlane.f32.xlu0 %v204_v17 }
  0xc6   : > { %208 = vadd.xlane.f32.xlu0 %v205_v18 }
 0x143   : > { %v181_v19 = vpop.xlane.xlu0 %180 }
 0x144   : > { %413 = vlog2.f32 %v181_v19 }
 0x147   : > { %v183_v20 = vpop.xlane.xlu1 %182  ;;  %v191_v21 = vpop.xlane.xlu0 %190 }
 0x148   : > { %415 = vlog2.f32 %v183_v20 }
 0x14b   : > { %v193_v22 = vpop.xlane.xlu0 %192 }
 0x14e   : > { %v414_v23 = vpop.eup %413 }
 0x14f   : > { %v185_v25 = vmul.f32 0.6931472, %v414_v23  ;;  %v207_v26 = vpop.xlane.xlu0 %206 }
 0x151   : > { %v188_v28 = vadd.f32 %v185_v25, %v171_v5 }
 0x152   : > { %v416_v30 = vpop.eup %415 }
 0x153   : > { %v187_v31 = vmul.f32 0.6931472, %v416_v30  ;;  %v210_v32 = vmul.f32 128.0, %v188_v28  ;;  %v209_v35 = vpop.xlane.xlu0 %208  ;;  %v214_v42 = vsub.f32 %v188_v28, %v207_v26 }
 0x155   : > { %v212_v36 = vsub.f32 %v210_v32, %v191_v21  ;;  %v189_v37 = vadd.f32 %v187_v31, %v173_v8  ;;  %v227_v47 = vsel %vm223_vm2, %v214_v42, 0.0 }
 0x156   : > { %v242_v50 = vsel %vm229_vm4, %v227_v47, 0.0 }
 0x157   : > { %v211_v38 = vmul.f32 128.0, %v189_v37  ;;  %v215_v39 = vsub.f32 %v189_v37, %v209_v35  ;;  %v225_v40 = vsel %vm223_vm2, %v212_v36, 0.0 }
 0x158   : > { %v230_v45 = vsel %vm229_vm4, %v225_v40, 0.0 }
 0x159   : > { %v213_v41 = vsub.f32 %v211_v38, %v193_v22  ;;  %v228_v44 = vsel %vm224_vm3, %v215_v39, 0.0 }
 0x15a   : > { %v243_v49 = vsel %vm229_vm4, %v228_v44, 0.0 }
 0x15b   : > { %v226_v43 = vsel %vm224_vm3, %v213_v41, 0.0  ;;  %v244_v51 = vadd.f32 %v243_v49, %v242_v50 }
 0x15c   : > { %v231_v46 = vsel %vm229_vm4, %v226_v43, 0.0 }
 0x15d   : > { %v232_v48 = vadd.f32 %v231_v46, %v230_v45 }
 0x15f   : > { %233 = vadd.xlane.f32.xlu0 %v232_v48 }
 0x163   : > { %245 = vadd.xlane.f32.xlu0 %v244_v51 }
 0x1ec   : > { %v234_v52 = vpop.xlane.xlu0 %233 }
 0x1ed   : > { %v235_v53 = vrot.slane %v234_v52, 4 }
 0x1ef   : > { %v236_v54 = vadd.f32 %v235_v53, %v234_v52 }
 0x1f0   : > { %v246_v55 = vpop.xlane.xlu0 %245 }
 0x1f1   : > { %v237_v56 = vrot.slane %v236_v54, 2  ;;  %v247_v57 = vrot.slane %v246_v55, 4 }
 0x1f3   : > { %v248_v58 = vadd.f32 %v247_v57, %v246_v55  ;;  %v238_v59 = vadd.f32 %v237_v56, %v236_v54 }
 0x1f5   : > { %v249_v60 = vrot.slane %v248_v58, 2  ;;  %v239_v61 = vrot.slane %v238_v59, 1 }
 0x1f7   : > { %v250_v62 = vadd.f32 %v249_v60, %v248_v58  ;;  %v240_v63 = vadd.f32 %v239_v61, %v238_v59 }
 0x1f9   : > { %363 = vpush %v240_v63  ;;  %v251_v0 = vrot.slane %v250_v62, 1 }
 0x1fb   : > { %v252_v1 = vadd.f32 %v251_v0, %v250_v62 }
 0x1fd   : > { %365 = vpush %v252_v1 }
 0x22a   : > { %s364_s5 = spop %363 }
 0x22b   : > { %v261_v3 = vstv %s364_s5 }
 0x22e   : > { %s366_s8 = spop %365 }
 0x22f   : > { %v259_v2 = vstv %s366_s8 }
 0x230   : > { %v260_v4 = vsel %vm258_vm8, %v259_v2, 0.0 }
 0x231   : > { %v262_v5 = vsel %vm256_vm9, %v261_v3, %v260_v4 }
 0x232   : > { %263 = vst [vmem:[%s153_s6] sm:$0xff] %v262_v5 }
 0x233   : > { %430 = shalt.err (!%p427_p3)
}
 0x234   : > { %s431_s25 = scalar_lea.hbm %s565_s17, 128  ;;  %s435_s28 = scalar_lea.hbm %s609_s2, 512 }
 0x235   : > { %p432_p4 = scmp.ne.s32.totalorder %s565_s17, %s431_s25  ;;  %p436_p9 = scmp.lt.u32.totalorder %s565_s17, %s609_s2 }
 0x236   : > { %p437_p10 = scmp.lt.u32.totalorder %s435_s28, %s431_s25  ;;  %p439_p12 = scmp.lt.u32.totalorder %s431_s25, %s565_s17 }
 0x237   : > { %p433_p7 = pnand %p432_p4, %p536_p5 }
 0x238   : > { %p438_p11 = por %p437_p10, %p436_p9 }
 0x239   : > { %p434_p8 = pneg %p433_p7 }
 0x23a   : > { %p440_p13 = por %p439_p12, %p438_p11 }
 0x23c   : > { %p441_p0 = pnand %p440_p13, %p434_p8 }
 0x23e   : > { %444 = shalt.err (!%p441_p0)
}
 0x23f   : > { %367 = dma.vmem_to_hbm [thread:$0]  (%p536_p5), %s567_s7, 128, %s565_s17, %s265_s13  }
 0x240 PF: > { %p373_p1 = scmp.ge.s32.totalorder %s479_s12, 2  ;;  %s290_s3 = sand.u32 1, %s467_s9  }
 0x241   : > { %s291_s4 = scalar_lea.sflag [#allocation3], %s290_s3 }
 0x242   : > { %p370_p2 = pnand %p373_p1, %p540_p6 }
 0x244   : > { %462 = dma.done.wait (!%p370_p2), %s291_s4, 128  }
 0x245   : > { %464 = vsyncadd (!%p370_p2), %s291_s4, 4294967168  ;;  %p12_p3 = scmp.ge.s32.totalorder %s523_s15, 6   ;;  %s612_s9 = smov %s471_s10 }
 0x246   : > { %s613_s10 = smov %s475_s11  ;;  %s614_s11 = smov %s534_s18 }
 0x247   : > { %s615_s12 = smov %s523_s15  ;;  %14 = sbr.rel (!%p12_p3) target bundleno = 3 (0x3), region = 66 }
 0x24e   :  { %296 = vsyncpa [#allocation3], 1 }
 0x24f   :  { %298 = vsyncpa [#allocation3 + $0x1], 1 }

</bundles_post_ra>
